<compile_context>
chip_gen: v7x
topology: tpu7x:2x2x1
jax: 0.10.0
libtpu: 0.0.40
codegen_flags: <defaults>
</compile_context>

<pallas_src>
import functools
import math

import jax
import jax.numpy as jnp
from jax import lax
from jax.experimental import pallas as pl
from jax.experimental.pallas import tpu as pltpu


# ----------------------------------------------------------------------------
# Kernel 1: fused QKV projection  (row-tiled:  y = x @ W_qkv + b_qkv)
# ----------------------------------------------------------------------------
def _qkv_proj_kernel(x_ref, w_ref, b_ref, q_ref, k_ref, v_ref, *, hidden):
    y = jnp.dot(x_ref[...], w_ref[...],
                preferred_element_type=jnp.float32) + b_ref[...]
    q_ref[...] = y[:, :hidden].astype(q_ref.dtype)
    k_ref[...] = y[:, hidden:2 * hidden].astype(k_ref.dtype)
    v_ref[...] = y[:, 2 * hidden:].astype(v_ref.dtype)


def qkv_projection(x2d, w_qkv, b_qkv, *, block_rows=512):
    """x2d: (N, H).  w_qkv: (H, 3H) already transposed/fused.  b_qkv: (1, 3H)."""
    n, h = x2d.shape
    h3 = w_qkv.shape[1]
    tm = min(block_rows, n)
    grid = (pl.cdiv(n, tm),)
    out_sd = jax.ShapeDtypeStruct((n, h), x2d.dtype)

    x_spec = pl.BlockSpec((tm, h), lambda i: (i, 0))
    w_spec = pl.BlockSpec((h, h3), lambda i: (0, 0))     # resident weights
    b_spec = pl.BlockSpec((1, h3), lambda i: (0, 0))
    o_spec = lambda: pl.BlockSpec((tm, h), lambda i: (i, 0))

    return pl.pallas_call(
        functools.partial(_qkv_proj_kernel, hidden=h),
        out_shape=(out_sd, out_sd, out_sd),
        grid=grid,
        in_specs=[x_spec, w_spec, b_spec],
        out_specs=(o_spec(), o_spec(), o_spec()),
        compiler_params=pltpu.CompilerParams(
            dimension_semantics=("parallel",)),
    )(x2d, w_qkv, b_qkv)


# ----------------------------------------------------------------------------
# Kernel 2: flash-style SDPA in (B, S, H) layout, per (batch, head-group) slab
# ----------------------------------------------------------------------------
def _sdpa_kernel(q_ref, k_ref, v_ref, mask_ref, o_ref,
                 m_sc, l_sc, acc_sc, *, scale, heads_per_block, head_dim):
    t = pl.program_id(2)

    @pl.when(t == 0)
    def _():
        m_sc[...] = jnp.full_like(m_sc, -1e30)
        l_sc[...] = jnp.zeros_like(l_sc)
        acc_sc[...] = jnp.zeros_like(acc_sc)

    mask = mask_ref[...].astype(jnp.float32)       # (1, TKV) additive key mask
    q_all = q_ref[...] * scale                     # fold scale into Q (S x D mults)
    k_all = k_ref[...]
    v_all = v_ref[...]

    for hd in range(heads_per_block):
        lo = hd * head_dim
        hi = lo + head_dim
        q = q_all[:, lo:hi]                        # (S, D)
        k = k_all[:, lo:hi]                        # (TKV, D)
        v = v_all[:, lo:hi]                        # (TKV, D)

        # contract on D without materializing k.T (no XLU transpose)
        s = lax.dot_general(q, k, (((1,), (1,)), ((), ())),
                            preferred_element_type=jnp.float32)   # (S, TKV)
        s = s + mask

        m_prev = m_sc[:, lo:hi]                                   # (S, D)
        m_new = jnp.maximum(m_prev, jnp.max(s, axis=-1, keepdims=True))
        alpha = jnp.exp(m_prev - m_new)                           # (S, D)
        p = jnp.exp(s - m_new[:, 0:1])                            # (S, TKV)

        l_sc[:, lo:hi] = alpha * l_sc[:, lo:hi] + jnp.sum(
            p, axis=-1, keepdims=True)
        acc_sc[:, lo:hi] = alpha * acc_sc[:, lo:hi] + jnp.dot(
            p.astype(v.dtype), v, preferred_element_type=jnp.float32)
        m_sc[:, lo:hi] = m_new

    @pl.when(t == pl.num_programs(2) - 1)
    def _():
        # single lane-dense slab store; divide -> EUP reciprocal
        o_ref[...] = (acc_sc[...] *
                      pl.reciprocal(l_sc[...], approx=True)).astype(o_ref.dtype)


def _heads_per_block(num_heads, head_dim):
    # smallest head group whose slab width is a multiple of 128 lanes
    for hpb in range(1, num_heads + 1):
        if num_heads % hpb == 0 and (hpb * head_dim) % 128 == 0:
            return hpb
    return num_heads                      # tiny demo: slab == full hidden size


def _kv_tile(seq_len, max_tile=512):
    if seq_len <= max_tile:
        return seq_len
    for t in (512, 384, 256, 128, 64, 32, 16, 8):
        if t <= max_tile and seq_len % t == 0:
            return t
    return seq_len


def sdpa_bsh(q3, k3, v3, mask2d, *, num_heads, head_dim, scale):
    """q3/k3/v3: (B, S, H) layout.  mask2d: (B, S) additive float mask."""
    B, S, H = q3.shape
    hpb = _heads_per_block(num_heads, head_dim)
    slab = hpb * head_dim
    n_groups = H // slab
    tkv = _kv_tile(S)
    n_kv = S // tkv

    kernel = functools.partial(_sdpa_kernel, scale=scale,
                               heads_per_block=hpb, head_dim=head_dim)

    q_spec = pl.BlockSpec((pl.Squeezed(), S, slab), lambda b, g, t: (b, 0, g))
    k_spec = pl.BlockSpec((pl.Squeezed(), tkv, slab), lambda b, g, t: (b, t, g))
    v_spec = pl.BlockSpec((pl.Squeezed(), tkv, slab), lambda b, g, t: (b, t, g))
    m_spec = pl.BlockSpec((1, tkv), lambda b, g, t: (b, t))
    o_spec = pl.BlockSpec((pl.Squeezed(), S, slab), lambda b, g, t: (b, 0, g))

    return pl.pallas_call(
        kernel,
        out_shape=jax.ShapeDtypeStruct((B, S, H), q3.dtype),
        grid=(B, n_groups, n_kv),
        in_specs=[q_spec, k_spec, v_spec, m_spec],
        out_specs=o_spec,
        scratch_shapes=[pltpu.VMEM((S, slab), jnp.float32),   # running max
                        pltpu.VMEM((S, slab), jnp.float32),   # running denom
                        pltpu.VMEM((S, slab), jnp.float32)],  # accumulator
        compiler_params=pltpu.CompilerParams(
            dimension_semantics=("parallel", "parallel", "arbitrary")),
    )(q3, k3, v3, mask2d)


# ----------------------------------------------------------------------------
# Module-equivalent wrapper
# ----------------------------------------------------------------------------
class NewIPEXBertSelfAttentionPallas:
    def __init__(self, hidden_size, num_attention_heads, params):
        assert hidden_size % num_attention_heads == 0
        self.num_attention_heads = num_attention_heads
        self.attention_head_size = hidden_size // num_attention_heads
        self.all_head_size = hidden_size
        self.scale = 1.0 / math.sqrt(float(self.attention_head_size))

        wq, bq, wk, bk, wv, bv = params
        # PyTorch nn.Linear layout is (out, in): y = x @ W.T + b.
        # Hoist the transpose + fuse the three projections once at init time.
        self.w_qkv = jnp.concatenate([wq.T, wk.T, wv.T], axis=1)     # (H, 3H)
        self.b_qkv = jnp.concatenate([bq, bk, bv])[None, :].astype(jnp.float32)

    def __call__(self, hidden_states, attention_mask=None):
        B, S, H = hidden_states.shape
        NH, D = self.num_attention_heads, self.attention_head_size

        # --- fused QKV projection (Pallas kernel 1) ---
        x2d = hidden_states.reshape(B * S, H)                 # free reshape
        q2d, k2d, v2d = qkv_projection(x2d, self.w_qkv, self.b_qkv)
        q3 = q2d.reshape(B, S, H)                             # free reshapes,
        k3 = k2d.reshape(B, S, H)                             # no relayout
        v3 = v2d.reshape(B, S, H)

        # HF-style additive key-padding mask (B, 1, 1, S) -> (B, S)
        if attention_mask is None:
            mask2d = jnp.zeros((B, S), dtype=jnp.float32)
        else:
            # TODO(synk): only (B,1,1,S) key-padding masks supported here;
            # full (B,1,S,S) extended masks need a (b,q,k)-indexed BlockSpec.
            mask2d = attention_mask.reshape(B, S).astype(jnp.float32)

        # --- SDPA in (B,S,H) layout (Pallas kernel 2) ---
        # TODO(synk): attention_probs_dropout_prob only applies in training;
        # IpexSDP_dropout runs with dropout_p=0.0 in eval, so it is omitted.
        ctx = sdpa_bsh(q3, k3, v3, mask2d,
                       num_heads=NH, head_dim=D, scale=self.scale)
        return (ctx,)     # already (B, S, all_head_size); no transpose needed


# ----------------------------------------------------------------------------
if __name__ == "__main__":
    B, S, HIDDEN, NH = 2, 8, 32, 4
    key = jax.random.PRNGKey(0)
    k_x, k_wq, k_wk, k_wv, k_bq, k_bk, k_bv, _ = jax.random.split(key, 8)

    hidden_states = jax.random.normal(k_x, (B, S, HIDDEN), dtype=jnp.float32)

    # deterministic synthetic parameters (PyTorch nn.Linear layout: (out, in))
    wq = jax.random.normal(k_wq, (HIDDEN, HIDDEN), dtype=jnp.float32) * 0.05
    wk = jax.random.normal(k_wk, (HIDDEN, HIDDEN), dtype=jnp.float32) * 0.05
    wv = jax.random.normal(k_wv, (HIDDEN, HIDDEN), dtype=jnp.float32) * 0.05
    bq = jax.random.normal(k_bq, (HIDDEN,), dtype=jnp.float32) * 0.05
    bk = jax.random.normal(k_bk, (HIDDEN,), dtype=jnp.float32) * 0.05
    bv = jax.random.normal(k_bv, (HIDDEN,), dtype=jnp.float32) * 0.05

    # HF-style additive attention mask (B,1,1,S): last token of batch 1 masked
    mask = jnp.zeros((B, 1, 1, S), dtype=jnp.float32)
    mask = mask.at[1, 0, 0, -1].set(-1e9)

    attn = NewIPEXBertSelfAttentionPallas(HIDDEN, NH, (wq, bq, wk, bk, wv, bv))
    (out,) = attn(hidden_states, attention_mask=mask)
    out = jax.block_until_ready(out)

    # pure-JAX reference check
    def ref(x, m):
        D = HIDDEN // NH
        q = (x @ wq.T + bq).reshape(B, S, NH, D).transpose(0, 2, 1, 3)
        k = (x @ wk.T + bk).reshape(B, S, NH, D).transpose(0, 2, 1, 3)
        v = (x @ wv.T + bv).reshape(B, S, NH, D).transpose(0, 2, 1, 3)
        s = jnp.einsum("bhqd,bhkd->bhqk", q, k) / jnp.sqrt(float(D))
        s = s + m
        p = jax.nn.softmax(s, axis=-1)
        o = jnp.einsum("bhqk,bhkd->bhqd", p, v)
        return o.transpose(0, 2, 1, 3).reshape(B, S, HIDDEN)

    expected = ref(hidden_states, mask)
    assert out.shape == (B, S, HIDDEN)
    assert jnp.allclose(out, expected, atol=2e-3, rtol=2e-3), (
        float(jnp.max(jnp.abs(out - expected))))
    print("KERNEL_OK")
</pallas_src>

<mosaic_0001>
module attributes {stable_mosaic.version = 11 : i64} {
  func.func @_qkv_proj_kernel(%arg0: i32, %arg1: memref<16x32xf32, #tpu.memory_space<vmem>>, %arg2: memref<32x96xf32, #tpu.memory_space<vmem>>, %arg3: memref<1x96xf32, #tpu.memory_space<vmem>>, %arg4: memref<16x32xf32, #tpu.memory_space<vmem>>, %arg5: memref<16x32xf32, #tpu.memory_space<vmem>>, %arg6: memref<16x32xf32, #tpu.memory_space<vmem>>) attributes {dimension_semantics = [#tpu.dimension_semantics<parallel>], iteration_bounds = array<i64: 1>, scalar_prefetch = 0 : i64, scratch_operands = 0 : i64, tpu.core_type = #tpu.core_type<tc>, window_params = [{transform_indices = @transform_0, window_bounds = array<i64: 16, 32>}, {pipeline_mode = #tpu.pipeline_mode<synchronous>, transform_indices = @transform_1, window_bounds = array<i64: 32, 96>}, {pipeline_mode = #tpu.pipeline_mode<synchronous>, transform_indices = @transform_2, window_bounds = array<i64: 1, 96>}, {transform_indices = @transform_3, window_bounds = array<i64: 16, 32>}, {transform_indices = @transform_4, window_bounds = array<i64: 16, 32>}, {transform_indices = @transform_5, window_bounds = array<i64: 16, 32>}]} {
    %c0 = arith.constant 0 : index
    %c0_0 = arith.constant 0 : index
    %0 = vector.load %arg1[%c0, %c0_0] : memref<16x32xf32, #tpu.memory_space<vmem>>, vector<16x32xf32>
    %c0_1 = arith.constant 0 : index
    %c0_2 = arith.constant 0 : index
    %1 = vector.load %arg2[%c0_1, %c0_2] : memref<32x96xf32, #tpu.memory_space<vmem>>, vector<32x96xf32>
    %cst = arith.constant dense<0.000000e+00> : vector<16x96xf32>
    %2 = tpu.matmul %0, %1, %cst {dimension_numbers = #tpu.dot_dimension_numbers<[1], [0], [0], [1], [0, 0, 1, 1], [], []>} : vector<16x32xf32>, vector<32x96xf32>, vector<16x96xf32> -> vector<16x96xf32>
    %c0_3 = arith.constant 0 : index
    %c0_4 = arith.constant 0 : index
    %3 = vector.load %arg3[%c0_3, %c0_4] : memref<1x96xf32, #tpu.memory_space<vmem>>, vector<1x96xf32>
    %4 = vector.broadcast %3 : vector<1x96xf32> to vector<16x96xf32>
    %5 = arith.addf %2, %4 : vector<16x96xf32>
    %6 = vector.extract_strided_slice %5 {offsets = [0, 0], sizes = [16, 32], strides = [1, 1]} : vector<16x96xf32> to vector<16x32xf32>
    %c0_5 = arith.constant 0 : index
    %c0_6 = arith.constant 0 : index
    %7 = vector.load %arg4[%c0_5, %c0_6] : memref<16x32xf32, #tpu.memory_space<vmem>>, vector<16x32xf32>
    tpu.vector_store %arg4[%c0_5, %c0_6], %6 {strides = array<i32>} : memref<16x32xf32, #tpu.memory_space<vmem>>, vector<16x32xf32>,
    %8 = vector.extract_strided_slice %5 {offsets = [0, 32], sizes = [16, 32], strides = [1, 1]} : vector<16x96xf32> to vector<16x32xf32>
    %c0_7 = arith.constant 0 : index
    %c0_8 = arith.constant 0 : index
    %9 = vector.load %arg5[%c0_7, %c0_8] : memref<16x32xf32, #tpu.memory_space<vmem>>, vector<16x32xf32>
    tpu.vector_store %arg5[%c0_7, %c0_8], %8 {strides = array<i32>} : memref<16x32xf32, #tpu.memory_space<vmem>>, vector<16x32xf32>,
    %10 = vector.extract_strided_slice %5 {offsets = [0, 64], sizes = [16, 32], strides = [1, 1]} : vector<16x96xf32> to vector<16x32xf32>
    %c0_9 = arith.constant 0 : index
    %c0_10 = arith.constant 0 : index
    %11 = vector.load %arg6[%c0_9, %c0_10] : memref<16x32xf32, #tpu.memory_space<vmem>>, vector<16x32xf32>
    tpu.vector_store %arg6[%c0_9, %c0_10], %10 {strides = array<i32>} : memref<16x32xf32, #tpu.memory_space<vmem>>, vector<16x32xf32>,
    return
  }
  func.func @transform_0(%arg0: i32) -> (i32, i32) {
    %c0_i32 = arith.constant 0 : i32
    %c0_i32_0 = arith.constant 0 : i32
    return %arg0, %c0_i32 : i32, i32
  }
  func.func @transform_1(%arg0: i32) -> (i32, i32) {
    %c0_i32 = arith.constant 0 : i32
    %c0_i32_0 = arith.constant 0 : i32
    %c0_i32_1 = arith.constant 0 : i32
    return %c0_i32, %c0_i32_0 : i32, i32
  }
  func.func @transform_2(%arg0: i32) -> (i32, i32) {
    %c0_i32 = arith.constant 0 : i32
    %c0_i32_0 = arith.constant 0 : i32
    %c0_i32_1 = arith.constant 0 : i32
    return %c0_i32, %c0_i32_0 : i32, i32
  }
  func.func @transform_3(%arg0: i32) -> (i32, i32) {
    %c0_i32 = arith.constant 0 : i32
    %c0_i32_0 = arith.constant 0 : i32
    return %arg0, %c0_i32 : i32, i32
  }
  func.func @transform_4(%arg0: i32) -> (i32, i32) {
    %c0_i32 = arith.constant 0 : i32
    %c0_i32_0 = arith.constant 0 : i32
    return %arg0, %c0_i32 : i32, i32
  }
  func.func @transform_5(%arg0: i32) -> (i32, i32) {
    %c0_i32 = arith.constant 0 : i32
    %c0_i32_0 = arith.constant 0 : i32
    return %arg0, %c0_i32 : i32, i32
  }
}

</mosaic_0001>

<bundles_post_ra>
// kernel: tpu_custom_call.1
= control target key start
LH: loop header
LB: loop body
LE: loop exit
PB: predicated region body
PF: predicated region fallthrough
CT: control target
= control target key end

     0   :  { %11 = vsyncpa [#allocation3], 0  ;;  %s498_s0 = inlined_call_operand.hbm [shape: f32[16,32], index: 0, kind: input, shape index: {}]   ;;  %s499_s1 = inlined_call_operand.hbm [shape: f32[32,96], index: 1, kind: input, shape index: {}]   ;;  %s500_s2 = inlined_call_operand.vmem [shape: f32[1,96], index: 2, kind: input, shape index: {}]   ;;  %s501_s3 = inlined_call_operand.hbm [shape: f32[16,32], index: 3, kind: output, shape index: {0}]   ;;  %s502_s4 = inlined_call_operand.hbm [shape: f32[16,32], index: 4, kind: output, shape index: {1}]   ;;  %s503_s5 = inlined_call_operand.hbm [shape: f32[16,32], index: 5, kind: output, shape index: {2}]  }
   0x1   :  { %12 = vsyncpa [#allocation6], 0 }
   0x2   :  { %13 = vsyncpa [#allocation4], 0 }
   0x3   :  { %14 = vsyncpa [#allocation9], 0  ;;  %s366_s18 = smov [#allocation2]   ;;  %s248_s22 = scalar_lea.hbm %s498_s0, 256 }
   0x4   :  { %s20_s19 = sshll.u32 %s366_s18, 4  ;;  %p249_p0 = scmp.ne.s32.totalorder %s498_s0, %s248_s22  ;;  %s21_s19 = int_to_ptr.vmem [resolvable:$true] %s20_s19 }
   0x5   :  { %p252_p1 = scmp.lt.u32.totalorder %s248_s22, %s498_s0 }
   0x7   :  { %p254_p2 = pnand %p252_p1, %p249_p0 }
   0x9   :  { %257 = shalt.err (!%p254_p2)
}
   0xa   :  { %s258_s27 = scalar_lea.vmem %s21_s19, 256  ;;  %p263_p4 = scmp.lt.s32.totalorder %s21_s19, %s21_s19 }
   0xb   :  { %p259_p3 = scmp.ne.s32.totalorder %s21_s19, %s258_s27  ;;  %p264_p5 = scmp.lt.s32.totalorder %s258_s27, %s258_s27 }
   0xd   :  { %p265_p6 = por %p264_p5, %p263_p4 }
   0xf   :  { %p266_p7 = pnand %p265_p6, %p259_p3 }
  0x11   :  { %269 = shalt.err (!%p266_p7)
}
  0x12   :  { %s367_s28 = smov 128   ;;  %s368_s29 = smov 8  }
  0x13   :  { %26 = dma.hbm_to_vmem [thread:$0]  %s498_s0, 256, %s21_s19, [#allocation3], %s367_s28, %s367_s28, %s368_s29  }
  0x14   :  { %s369_s7 = smov [#allocation5]   ;;  %s270_s11 = scalar_lea.hbm %s499_s1, 512 }
  0x15   :  { %s32_s8 = sshll.u32 %s369_s7, 4  ;;  %p271_p8 = scmp.ne.s32.totalorder %s499_s1, %s270_s11  ;;  %s33_s8 = int_to_ptr.vmem [resolvable:$true] %s32_s8 }
  0x16   :  { %p274_p9 = scmp.lt.u32.totalorder %s270_s11, %s499_s1 }
  0x18   :  { %p276_p10 = pnand %p274_p9, %p271_p8 }
  0x1a   :  { %279 = shalt.err (!%p276_p10)
}
  0x1b   :  { %s280_s16 = scalar_lea.vmem %s33_s8, 512  ;;  %p285_p12 = scmp.lt.s32.totalorder %s33_s8, %s33_s8 }
  0x1c   :  { %p281_p11 = scmp.ne.s32.totalorder %s33_s8, %s280_s16  ;;  %p286_p13 = scmp.lt.s32.totalorder %s280_s16, %s280_s16 }
  0x1e   :  { %p287_p0 = por %p286_p13, %p285_p12 }
  0x20   :  { %p288_p1 = pnand %p287_p0, %p281_p11 }
  0x22   :  { %291 = shalt.err (!%p288_p1)
}
  0x23   :  { %38 = dma.hbm_to_vmem [thread:$0]  %s499_s1, 512, %s33_s8, [#allocation6], %s367_s28, %s367_s28, %s368_s29  }
  0x24   :  { %358 = dma.done.wait [#allocation3], 256  }
  0x25   :  { %359 = vsyncadd [#allocation3], 4294967040 }
  0x26   :  { %360 = dma.done.wait [#allocation6], 512  }
  0x27   :  { %361 = vsyncadd [#allocation6], 4294966784  ;;  %vm60_vm0 = vcmask 261120   ;;  %v49_v0 = vld [vmem:[#allocation5] sm:$0xff]  ;;  %v50_v1 = vld [vmem:[#allocation5 + $0x8] sm:$0xff]  ;;  %s370_s19 = smov [#allocation7]  }
  0x28   :  { %v51_v2 = vld [vmem:[#allocation5 + $0x10] sm:$0xff]  ;;  %v231_v3 = vpack.c.bf16 %v50_v1, %v49_v0  ;;  %v52_v4 = vld [vmem:[#allocation5 + $0x18] sm:$0xff]  ;;  %s167_s20 = sshll.u32 %s370_s19, 4  ;;  %s371_s21 = smov 64   ;;  %s168_s20 = int_to_ptr.vmem [resolvable:$true] %s167_s20 }
  0x29   :  { %v47_v5 = vld [vmem:[#allocation2] sm:$0xff]  ;;  %v235_v6 = vpack.c.bf16 %v52_v4, %v51_v2  ;;  %v48_v7 = vld [vmem:[#allocation2 + $0x8] sm:$0xff]  ;;  %s372_s22 = smov 96   ;;  %s292_s23 = scalar_lea.vmem %s168_s20, 256 }
  0x2a   :  { %228 = vmatprep.mubr.msk.f32.mxu0 %vm60_vm0, %v47_v5  ;;  %232 = vmatprep.subr.bf16.mxu0 %v231_v3  ;;  %v211_v8 = vld [vmem:[%s500_s2] ss:$0 sm:$0xff]  ;;  %p293_p2 = scmp.ne.s32.totalorder %s168_s20, %s292_s23  ;;  %p297_p3 = scmp.lt.s32.totalorder %s168_s20, %s168_s20 }
  0x2b   :  { %234 = vmatpush3.bf16.msra.mxu0 %v231_v3  ;;  %p298_p4 = scmp.lt.s32.totalorder %s292_s23, %s292_s23 }
  0x2c   :  { %236 = vmatprep.subr.bf16.mxu0 %v235_v6 }
  0x2d   :  { %p299_p5 = por %p298_p4, %p297_p3 }
  0x2f   :  { %238 = vmatpush3.bf16.msra.mxu0 %v235_v6  ;;  %p300_p6 = pnand %p299_p5, %p293_p2 }
  0x32   :  { %229 = vmatmul.mubr.msk.f32.vlgmr.msra.gmra.mrb[0].mxu0 %vm60_vm0, %v48_v7 }
 0x105   :  { %v230_v9 = vpop.f32.mrb[0].mxu0 }
 0x106   :  { %v139_v10 = vadd.f32 %v230_v9, %v211_v8  ;;  %v133_v11 = vpop.f32.mrb[1].mxu0 }
 0x107   :  { %v134_v12 = vadd.f32 %v211_v8, %v133_v11 }
 0x108   :  { %143 = vst.msk [vmem:[#allocation7 + $0x8] sm:$0xff] %vm60_vm0, %v139_v10 }
 0x109   :  { %142 = vst.msk [vmem:[#allocation7] sm:$0xff] %vm60_vm0, %v134_v12  ;;  %154 = vrot.lane.b32.xlu1 %v134_v12, %s371_s21  ;;  %146 = vrot.lane.b32.xlu0 %v134_v12, %s372_s22 }
 0x10a   :  { %303 = shalt.err (!%p300_p6)
}
 0x10b   :  { %s304_s25 = scalar_lea.hbm %s501_s3, 256 }
 0x10c   :  { %p305_p7 = scmp.ne.s32.totalorder %s501_s3, %s304_s25  ;;  %p308_p8 = scmp.lt.u32.totalorder %s304_s25, %s501_s3 }
 0x10e   :  { %p310_p9 = pnand %p308_p8, %p305_p7 }
 0x110   :  { %313 = shalt.err (!%p310_p9)
}
 0x111   :  { %173 = dma.vmem_to_hbm [thread:$0]  %s168_s20, 256, %s501_s3, [#allocation4], %s367_s28, %s367_s28, %s368_s29  }
 0x112   :  { %156 = vrot.lane.b32.xlu1 %v139_v10, %s371_s21  ;;  %148 = vrot.lane.b32.xlu0 %v139_v10, %s372_s22  ;;  %s373_s9 = smov [#allocation8]   ;;  %s374_s11 = smov [#allocation10]  }
 0x113   :  { %s179_s10 = sshll.u32 %s373_s9, 4  ;;  %s191_s12 = sshll.u32 %s374_s11, 4  ;;  %s180_s10 = int_to_ptr.vmem [resolvable:$true] %s179_s10  ;;  %s459_s12 = int_to_ptr.vmem [resolvable:$true] %s191_s12 }
 0x114   :  { %s314_s3 = scalar_lea.vmem %s180_s10, 256  ;;  %p319_p11 = scmp.lt.s32.totalorder %s180_s10, %s180_s10 }
 0x115   :  { %p315_p10 = scmp.ne.s32.totalorder %s180_s10, %s314_s3  ;;  %p320_p12 = scmp.lt.s32.totalorder %s314_s3, %s314_s3 }
 0x117   :  { %p321_p13 = por %p320_p12, %p319_p11 }
 0x119   :  { %p322_p0 = pnand %p321_p13, %p315_p10 }
 0x17b   :  { %v155_v13 = vpop.permute.xlu1 %154  ;;  %v147_v14 = vpop.permute.xlu0 %146 }
 0x17c   :  { %160 = vst.msk [vmem:[#allocation10] sm:$0xff] %vm60_vm0, %v155_v13  ;;  %152 = vst.msk [vmem:[#allocation8] sm:$0xff] %vm60_vm0, %v147_v14 }
 0x184   :  { %v157_v15 = vpop.permute.xlu1 %156  ;;  %v149_v16 = vpop.permute.xlu0 %148 }
 0x185   :  { %161 = vst.msk [vmem:[#allocation10 + $0x8] sm:$0xff] %vm60_vm0, %v157_v15  ;;  %153 = vst.msk [vmem:[#allocation8 + $0x8] sm:$0xff] %vm60_vm0, %v149_v16 }
 0x186   :  { %325 = shalt.err (!%p322_p0)
}
 0x187   :  { %s326_s15 = scalar_lea.hbm %s502_s4, 256 }
 0x188   :  { %p327_p1 = scmp.ne.s32.totalorder %s502_s4, %s326_s15  ;;  %p330_p2 = scmp.lt.u32.totalorder %s326_s15, %s502_s4 }
 0x18a   :  { %p332_p3 = pnand %p330_p2, %p327_p1 }
 0x18c   :  { %335 = shalt.err (!%p332_p3)
}
 0x18d   :  { %185 = dma.vmem_to_hbm [thread:$0]  %s180_s10, 256, %s502_s4, [#allocation9], %s367_s28, %s367_s28, %s368_s29  }
 0x18e   :  { %s336_s20 = scalar_lea.vmem %s459_s12, 256  ;;  %p341_p5 = scmp.lt.s32.totalorder %s459_s12, %s459_s12 }
 0x18f   :  { %p337_p4 = scmp.ne.s32.totalorder %s459_s12, %s336_s20  ;;  %p342_p6 = scmp.lt.s32.totalorder %s336_s20, %s336_s20 }
 0x191   :  { %p343_p7 = por %p342_p6, %p341_p5 }
 0x193   :  { %p344_p8 = pnand %p343_p7, %p337_p4 }
 0x195   :  { %347 = shalt.err (!%p344_p8)
}
 0x196   :  { %s348_s23 = scalar_lea.hbm %s503_s5, 256 }
 0x197   :  { %p349_p9 = scmp.ne.s32.totalorder %s503_s5, %s348_s23  ;;  %p352_p10 = scmp.lt.u32.totalorder %s348_s23, %s503_s5 }
 0x199   :  { %p354_p11 = pnand %p352_p10, %p349_p9 }
 0x19b   :  { %357 = shalt.err (!%p354_p11)
}
 0x19c   :  { %197 = dma.vmem_to_hbm [thread:$0]  %s459_s12, 256, %s503_s5, [#allocation9], %s367_s28, %s367_s28, %s368_s29  }
 0x19d   :  { %362 = dma.done.wait [#allocation4], 256  }
 0x19e   :  { %363 = vsyncadd [#allocation4], 4294967040 }
 0x19f   :  { %364 = dma.done.wait [#allocation9], 512  }
 0x1a0   :  { %365 = vsyncadd [#allocation9], 4294966784 }
 0x1a1   :  { %207 = vsyncpa [#allocation3], 1 }
 0x1a2   :  { %208 = vsyncpa [#allocation6], 1 }
 0x1a3   :  { %209 = vsyncpa [#allocation4], 1 }
 0x1a4   :  { %210 = vsyncpa [#allocation9], 1 }

</bundles_post_ra>
